<compile_context>
chip_gen: v5e
topology: v5e:2x2
jax: 0.10.0
libtpu: 0.0.40
codegen_flags: <defaults>
</compile_context>

<pallas_src>
import jax
import jax.numpy as jnp
from jax import lax
from jax.experimental import pallas as pl
from jax.experimental.pallas import tpu as pltpu

_EPS = 1e-12  # matches F.normalize / torch default eps for the l2-norm clamp


def _raslerp_kernel(x_ref, wfn_t_ref, wbs_t_ref, o_ref):
    """x_ref: (tn, D); wfn_t_ref / wbs_t_ref: (D, D) bf16 pre-transposed weights."""
    x_in = x_ref[...]
    x = x_in.astype(jnp.float32)            # residual / lerp math in f32
    x_bf = x_in.astype(jnp.bfloat16)        # MXU operand

    # raw = fn(x)   (branch fn: linear, no bias) — bf16 operands, f32 accumulate on MXU
    raw = jnp.dot(x_bf, wfn_t_ref[...], preferred_element_type=jnp.float32)

    # Matmul #2 depends only on `raw`, NOT on the normalized value:
    #   l2norm(raw) @ Wbs^T == s * (raw @ Wbs^T),   s = rsqrt(max(||raw||^2, eps^2))
    # so both MXU bursts run back-to-back while the cross-lane reduce + rsqrt
    # proceed on the XLU/EUP slots.
    r2 = jnp.dot(raw.astype(jnp.bfloat16), wbs_t_ref[...],
                 preferred_element_type=jnp.float32)

    s = lax.rsqrt(jnp.maximum(jnp.sum(raw * raw, axis=-1, keepdims=True), _EPS * _EPS))
    out = raw * s          # out = self.l2norm(fn(x))
    bs = r2 * s            # branch_scale = NormLinear(out); 'linear' activation = identity

    # out = residual + branch_scale * (out - residual);  out = self.l2norm(out)
    mix = x + bs * (out - x)
    inv = lax.rsqrt(jnp.maximum(jnp.sum(mix * mix, axis=-1, keepdims=True), _EPS * _EPS))
    o_ref[...] = (mix * inv).astype(o_ref.dtype)


def prepare_weights(w_fn, w_bs):
    """One-time parameter glue (PyTorch parametrization equivalent).

    NormLinear(norm_dim_in=True, parametrize=True): effective weight is each row (output unit)
    l2-normalized over the input dim.  Pre-transpose so the kernel computes x @ W^T as a plain
    lane-dense matmul, and cast to bf16 for the MXU.  Do this once per weight update, not per step.
    """
    w_bs_n = w_bs * lax.rsqrt(
        jnp.maximum(jnp.sum(w_bs * w_bs, axis=-1, keepdims=True), _EPS * _EPS))
    return (jnp.asarray(w_fn.T, dtype=jnp.bfloat16),
            jnp.asarray(w_bs_n.T, dtype=jnp.bfloat16))


def residual_adaptive_spherical_lerp(x, wfn_t, wbs_t, *, tile_n=512, out_dtype=None):
    """x: (B, T, D) f32 or bf16.  wfn_t / wbs_t: (D, D) bf16 from prepare_weights().

    Output dtype defaults to x.dtype; pass bf16 input (and/or out_dtype=bf16) to halve HBM
    traffic — the kernel is bandwidth-bound at small D on every TPU generation.
    """
    B, T, D = x.shape
    N = B * T
    out_dtype = x.dtype if out_dtype is None else jnp.dtype(out_dtype)
    xf = x.reshape(N, D)

    # Row tile: as big as fits.  No host-side padding: a partial final block is fine since all
    # math is strictly row-wise (garbage rows never contaminate valid rows and their stores are
    # masked by Pallas).
    if N <= tile_n:
        tile_n = N                                  # single block equal to the full row extent
    else:
        tile_n = max(8, (tile_n // 8) * 8)          # sublane-aligned tile smaller than N

    # VMEM budget from hardware, leaving headroom for Mosaic scratch / semaphores.
    try:
        info = pltpu.get_tpu_info()
        vmem_cap = int(getattr(info, "vmem_capacity_bytes", 64 << 20))
    except Exception:  # not on TPU at trace time, etc.
        vmem_cap = 64 << 20                         # conservative: v7x per-TensorCore size
    vmem_budget = max(vmem_cap - (16 << 20), 16 << 20)

    w_bytes = 2 * D * D * 2                         # both bf16 (D, D) weights, resident

    def _working_set(tn):
        io = 2 * tn * D * (xf.dtype.itemsize + out_dtype.itemsize)   # double-buffered tiles
        scratch = 6 * tn * D * 4                                     # f32 intermediates
        return w_bytes + io + scratch

    while _working_set(tile_n) > vmem_budget and tile_n > 128:
        tile_n = max(128, ((tile_n // 2) // 8) * 8)
    # NOTE: for very large D (when w_bytes alone nears the budget, ~D>2900 on v7x) the weights
    # should instead be streamed via an extra grid axis; not needed at these model sizes.
    # NOTE: on v6e/v7x the MXU is 2x256x256, so D as a multiple of 256 fills it best; D=128 is
    # fine here because the kernel is memory-bound at this size.

    grid = (pl.cdiv(N, tile_n),)
    vmem_limit = int(min(vmem_budget, max(2 * _working_set(tile_n), 32 << 20)))

    cost = pl.CostEstimate(
        flops=4 * N * D * D,                        # two (tn,D)x(D,D) matmuls
        transcendentals=2 * N,                      # two rsqrt per row
        bytes_accessed=N * D * (xf.dtype.itemsize + out_dtype.itemsize) + w_bytes,
    )

    out = pl.pallas_call(
        _raslerp_kernel,
        out_shape=jax.ShapeDtypeStruct((N, D), out_dtype),
        grid_spec=pltpu.PrefetchScalarGridSpec(
            num_scalar_prefetch=0,
            grid=grid,
            in_specs=[
                pl.BlockSpec((tile_n, D), lambda i: (i, 0)),
                # weights: whole-array, single-buffered VMEM residents (constant per grid step)
                pl.BlockSpec(memory_space=pltpu.MemorySpace.VMEM),
                pl.BlockSpec(memory_space=pltpu.MemorySpace.VMEM),
            ],
            out_specs=pl.BlockSpec((tile_n, D), lambda i: (i, 0)),
        ),
        compiler_params=pltpu.CompilerParams(
            dimension_semantics=("parallel",),      # rows split across TCs on v7x
            vmem_limit_bytes=vmem_limit),
        cost_estimate=cost,
    )(xf, wfn_t, wbs_t)

    return out.reshape(B, T, D)


def _reference(x, w_fn, w_bs):
    """Pure-JAX f32 reference mirroring the PyTorch forward."""
    def l2n(t):
        return t / jnp.maximum(jnp.sqrt(jnp.sum(t * t, axis=-1, keepdims=True)), _EPS)
    residual = x
    out = jnp.einsum("btd,od->bto", x, w_fn)            # fn(x): linear, no bias
    out = l2n(out)                                       # l2norm(out)
    w_bs_n = w_bs / jnp.maximum(
        jnp.sqrt(jnp.sum(w_bs * w_bs, axis=-1, keepdims=True)), _EPS)
    bs = jnp.einsum("btd,od->bto", out, w_bs_n)          # NormLinear (identity activation)
    out = residual + bs * (out - residual)
    return l2n(out)


# TODO(synk): tuple-output passthrough of fn (`out, *rest = out`) not modeled — the synthetic
# branch fn returns a single tensor; only the default 'linear' interpolation activation is fused.

if __name__ == "__main__":
    B, T, D = 2, 8, 128
    key = jax.random.PRNGKey(0)
    kx, kw1, kw2 = jax.random.split(key, 3)

    x = jax.random.normal(kx, (B, T, D), dtype=jnp.float32)
    # deterministic parameter init (PyTorch nn.Linear-ish scale), shapes (out, in)
    w_fn = jax.random.normal(kw1, (D, D), dtype=jnp.float32) * (D ** -0.5)
    w_bs = jax.random.normal(kw2, (D, D), dtype=jnp.float32) * (D ** -0.5)

    wfn_t, wbs_t = prepare_weights(w_fn, w_bs)

    y = jax.block_until_ready(residual_adaptive_spherical_lerp(x, wfn_t, wbs_t))
    y_ref = _reference(x, w_fn, w_bs)
    # bf16 matmul operands (f32 accumulate) -> slightly loosened tolerance; rows are unit-norm.
    assert jnp.allclose(y, y_ref, atol=2e-2, rtol=2e-2), "mismatch vs reference"

    # ragged-N path (N = 3*5 = 15 rows): partial block handled in-kernel, no host-side pad copy
    x2 = jax.random.normal(key, (3, 5, D), dtype=jnp.float32)
    y2 = jax.block_until_ready(residual_adaptive_spherical_lerp(x2, wfn_t, wbs_t))
    y2_ref = _reference(x2, w_fn, w_bs)
    assert jnp.allclose(y2, y2_ref, atol=2e-2, rtol=2e-2), "mismatch vs reference (ragged)"

    # bf16 I/O path (halves HBM traffic for bandwidth-bound deployments)
    y3 = jax.block_until_ready(
        residual_adaptive_spherical_lerp(x.astype(jnp.bfloat16), wfn_t, wbs_t))
    assert jnp.allclose(y3.astype(jnp.float32), y_ref, atol=4e-2, rtol=4e-2), \
        "mismatch vs reference (bf16 I/O)"

    print("KERNEL_OK")
</pallas_src>

<mosaic_0001>
module attributes {stable_mosaic.version = 11 : i64} {
  func.func @_raslerp_kernel(%arg0: i32, %arg1: memref<16x128xf32, #tpu.memory_space<vmem>>, %arg2: memref<128x128xbf16, #tpu.memory_space<vmem>>, %arg3: memref<128x128xbf16, #tpu.memory_space<vmem>>, %arg4: memref<16x128xf32, #tpu.memory_space<vmem>>) attributes {dimension_semantics = [#tpu.dimension_semantics<parallel>], iteration_bounds = array<i64: 1>, scalar_prefetch = 0 : i64, scratch_operands = 0 : i64, tpu.core_type = #tpu.core_type<tc>, window_params = [{transform_indices = @transform_0, window_bounds = array<i64: 16, 128>}, {pipeline_mode = #tpu.pipeline_mode<synchronous>, transform_indices = @transform_1, window_bounds = array<i64: 128, 128>}, {pipeline_mode = #tpu.pipeline_mode<synchronous>, transform_indices = @transform_2, window_bounds = array<i64: 128, 128>}, {transform_indices = @transform_3, window_bounds = array<i64: 16, 128>}]} {
    %c0 = arith.constant 0 : index
    %c0_0 = arith.constant 0 : index
    %0 = vector.load %arg1[%c0, %c0_0] : memref<16x128xf32, #tpu.memory_space<vmem>>, vector<16x128xf32>
    %1 = arith.truncf %0 : vector<16x128xf32> to vector<16x128xbf16>
    %c0_1 = arith.constant 0 : index
    %c0_2 = arith.constant 0 : index
    %2 = vector.load %arg2[%c0_1, %c0_2] : memref<128x128xbf16, #tpu.memory_space<vmem>>, vector<128x128xbf16>
    %cst = arith.constant dense<0.000000e+00> : vector<16x128xf32>
    %3 = tpu.matmul %1, %2, %cst {dimension_numbers = #tpu.dot_dimension_numbers<[1], [0], [0], [1], [0, 0, 1, 1], [], []>} : vector<16x128xbf16>, vector<128x128xbf16>, vector<16x128xf32> -> vector<16x128xf32>
    %4 = arith.truncf %3 : vector<16x128xf32> to vector<16x128xbf16>
    %c0_3 = arith.constant 0 : index
    %c0_4 = arith.constant 0 : index
    %5 = vector.load %arg3[%c0_3, %c0_4] : memref<128x128xbf16, #tpu.memory_space<vmem>>, vector<128x128xbf16>
    %cst_5 = arith.constant dense<0.000000e+00> : vector<16x128xf32>
    %6 = tpu.matmul %4, %5, %cst_5 {dimension_numbers = #tpu.dot_dimension_numbers<[1], [0], [0], [1], [0, 0, 1, 1], [], []>} : vector<16x128xbf16>, vector<128x128xbf16>, vector<16x128xf32> -> vector<16x128xf32>
    %7 = arith.mulf %3, %3 : vector<16x128xf32>
    %cst_6 = arith.constant dense<0.000000e+00> : vector<16xf32>
    %8 = vector.multi_reduction <add>, %7, %cst_6 [1] : vector<16x128xf32> to vector<16xf32>
    %9 = vector.shape_cast %8 : vector<16xf32> to vector<16x1xf32>
    %cst_7 = arith.constant 1.000000e-24 : f32
    %10 = vector.broadcast %cst_7 : f32 to vector<16x1xf32>
    %11 = arith.maximumf %9, %10 : vector<16x1xf32>
    %12 = math.rsqrt %11 : vector<16x1xf32>
    %13 = vector.broadcast %12 : vector<16x1xf32> to vector<16x128xf32>
    %14 = arith.mulf %3, %13 : vector<16x128xf32>
    %15 = vector.broadcast %12 : vector<16x1xf32> to vector<16x128xf32>
    %16 = arith.mulf %6, %15 : vector<16x128xf32>
    %17 = arith.subf %14, %0 : vector<16x128xf32>
    %18 = arith.mulf %16, %17 : vector<16x128xf32>
    %19 = arith.addf %0, %18 : vector<16x128xf32>
    %20 = arith.mulf %19, %19 : vector<16x128xf32>
    %cst_8 = arith.constant dense<0.000000e+00> : vector<16xf32>
    %21 = vector.multi_reduction <add>, %20, %cst_8 [1] : vector<16x128xf32> to vector<16xf32>
    %22 = vector.shape_cast %21 : vector<16xf32> to vector<16x1xf32>
    %cst_9 = arith.constant 1.000000e-24 : f32
    %23 = vector.broadcast %cst_9 : f32 to vector<16x1xf32>
    %24 = arith.maximumf %22, %23 : vector<16x1xf32>
    %25 = math.rsqrt %24 : vector<16x1xf32>
    %26 = vector.broadcast %25 : vector<16x1xf32> to vector<16x128xf32>
    %27 = arith.mulf %19, %26 : vector<16x128xf32>
    %c0_10 = arith.constant 0 : index
    %c0_11 = arith.constant 0 : index
    %28 = vector.load %arg4[%c0_10, %c0_11] : memref<16x128xf32, #tpu.memory_space<vmem>>, vector<16x128xf32>
    tpu.vector_store %arg4[%c0_10, %c0_11], %27 {strides = array<i32>} : memref<16x128xf32, #tpu.memory_space<vmem>>, vector<16x128xf32>,
    return
  }
  func.func @transform_0(%arg0: i32) -> (i32, i32) {
    %c0_i32 = arith.constant 0 : i32
    %c0_i32_0 = arith.constant 0 : i32
    return %arg0, %c0_i32 : i32, i32
  }
  func.func @transform_1(%arg0: i32) -> (i32, i32) {
    %c0_i32 = arith.constant 0 : i32
    %c0_i32_0 = arith.constant 0 : i32
    %c0_i32_1 = arith.constant 0 : i32
    return %c0_i32, %c0_i32_0 : i32, i32
  }
  func.func @transform_2(%arg0: i32) -> (i32, i32) {
    %c0_i32 = arith.constant 0 : i32
    %c0_i32_0 = arith.constant 0 : i32
    %c0_i32_1 = arith.constant 0 : i32
    return %c0_i32, %c0_i32_0 : i32, i32
  }
  func.func @transform_3(%arg0: i32) -> (i32, i32) {
    %c0_i32 = arith.constant 0 : i32
    %c0_i32_0 = arith.constant 0 : i32
    return %arg0, %c0_i32 : i32, i32
  }
}

</mosaic_0001>

<bundles_post_ra>
// kernel: tpu_custom_call.1
= control target key start
LH: loop header
LB: loop body
LE: loop exit
PB: predicated region body
PF: predicated region fallthrough
CT: control target
= control target key end

     0   :  { %8 = vsyncpa [#allocation3], 0  ;;  %s556_s0 = inlined_call_operand.hbm [shape: f32[16,128], index: 0, kind: input, shape index: {}]   ;;  %s557_s1 = inlined_call_operand.hbm [shape: bf16[128,128], index: 1, kind: input, shape index: {}]   ;;  %s558_s2 = inlined_call_operand.hbm [shape: bf16[128,128], index: 2, kind: input, shape index: {}]   ;;  %s559_s3 = inlined_call_operand.hbm [shape: f32[16,128], index: 3, kind: output, shape index: {}]  }
   0x1   :  { %9 = vsyncpa [#allocation6], 0  ;;  %s28_s14 = sshll.u32 %s557_s1, 4  ;;  %s29_s14 = int_to_ptr.hbm [resolvable:$true] %s28_s14 }
   0x2   :  { %10 = vsyncpa [#allocation4], 0  ;;  %s510_s15 = smov [#allocation5]   ;;  %s15_s19 = sshll.u32 %s556_s0, 4  ;;  %s16_s19 = int_to_ptr.hbm [resolvable:$true] %s15_s19 }
   0x3   :  { %s30_s16 = sshll.u32 %s510_s15, 4  ;;  %s511_s20 = smov 64   ;;  %s31_s16 = int_to_ptr.vmem [resolvable:$true] %s30_s16 }
   0x4   :  { %s512_s21 = smov 4   ;;  %s513_s22 = smov [#allocation2]  }
   0x5   :  { %36 = dma.hbm_to_vmem [thread:$0]  %s29_s14, 1024, %s31_s16, [#allocation6], %s511_s20, %s511_s20, %s512_s21  }
   0x6   :  { %s17_s23 = sshll.u32 %s513_s22, 4  ;;  %s514_s24 = smov 128   ;;  %s18_s23 = int_to_ptr.vmem [resolvable:$true] %s17_s23 }
   0x7   :  { %s515_s25 = smov 8   ;;  %s41_s27 = sshll.u32 %s558_s2, 4  ;;  %s42_s27 = int_to_ptr.hbm [resolvable:$true] %s41_s27 }
   0x8   :  { %23 = dma.hbm_to_vmem [thread:$0]  %s16_s19, 256, %s18_s23, [#allocation3], %s514_s24, %s514_s24, %s515_s25  }
   0x9   :  { %s516_s28 = smov [#allocation7]  }
   0xa   :  { %s43_s0 = sshll.u32 %s516_s28, 4  ;;  %s44_s0 = int_to_ptr.vmem [resolvable:$true] %s43_s0 }
   0xb   :  { %49 = dma.hbm_to_vmem [thread:$0]  %s42_s27, 1024, %s44_s0, [#allocation6], %s511_s20, %s511_s20, %s512_s21  }
   0xc   :  { %504 = dma.done.wait [#allocation3], 256  }
   0xd   :  { %505 = vsyncadd [#allocation3], 4294967040 }
   0xe   :  { %506 = dma.done.wait [#allocation6], 2048  }
   0xf   :  { %507 = vsyncadd [#allocation6], 4294965248  ;;  %v383_v0 = vld [vmem:[#allocation5 + $0x38] sm:$0xff]  ;;  %v382_v1 = vld [vmem:[#allocation5 + $0x30] sm:$0xff]  ;;  %s517_s2 = smov [#allocation8]   ;;  %s298_s5 = sshll.u32 %s559_s3, 4  ;;  %s299_s5 = int_to_ptr.hbm [resolvable:$true] %s298_s5 }
  0x10   :  { %129 = vmatpush.bf16.msra.mxu0 %v383_v0  ;;  %v391_v2 = vld [vmem:[#allocation7 + $0x38] sm:$0xff]  ;;  %v390_v3 = vld [vmem:[#allocation7 + $0x30] sm:$0xff]  ;;  %v381_v4 = vld [vmem:[#allocation5 + $0x28] sm:$0xff]  ;;  %s296_s29 = sshll.u32 %s517_s2, 4  ;;  %s297_s29 = int_to_ptr.vmem [resolvable:$true] %s296_s29 }
  0x11   :  { %208 = vmatpush.bf16.msra.mxu1 %v391_v2  ;;  %v389_v5 = vld [vmem:[#allocation7 + $0x28] sm:$0xff]  ;;  %v380_v6 = vld [vmem:[#allocation5 + $0x20] sm:$0xff]  ;;  %v379_v8 = vld [vmem:[#allocation5 + $0x18] sm:$0xff] }
  0x12   :  { %v388_v7 = vld [vmem:[#allocation7 + $0x20] sm:$0xff]  ;;  %v387_v9 = vld [vmem:[#allocation7 + $0x18] sm:$0xff]  ;;  %v378_v10 = vld [vmem:[#allocation5 + $0x10] sm:$0xff] }
  0x13   :  { %v377_v11 = vld [vmem:[#allocation5 + $0x8] sm:$0xff]  ;;  %v376_v12 = vld [vmem:[#allocation5] sm:$0xff]  ;;  %v62_v13 = vld [vmem:[#allocation2] sm:$0xff] }
  0x14   :  { %130 = vmatpush.bf16.msra.mxu0 %v382_v1  ;;  %v63_v14 = vld [vmem:[#allocation2 + $0x8] sm:$0xff]  ;;  %v386_v16 = vld [vmem:[#allocation7 + $0x10] sm:$0xff]  ;;  %v385_v17 = vld [vmem:[#allocation7 + $0x8] sm:$0xff] }
  0x15   :  { %209 = vmatpush.bf16.msra.mxu1 %v390_v3  ;;  %v64_v15 = vpack.c.bf16 %v63_v14, %v62_v13  ;;  %v384_v18 = vld [vmem:[#allocation7] sm:$0xff] }
  0x18   :  { %131 = vmatpush.bf16.msra.mxu0 %v381_v4 }
  0x19   :  { %210 = vmatpush.bf16.msra.mxu1 %v389_v5 }
  0x1c   :  { %132 = vmatpush.bf16.msra.mxu0 %v380_v6 }
  0x1d   :  { %211 = vmatpush.bf16.msra.mxu1 %v388_v7 }
  0x20   :  { %133 = vmatpush.bf16.msra.mxu0 %v379_v8 }
  0x21   :  { %212 = vmatpush.bf16.msra.mxu1 %v387_v9 }
  0x24   :  { %134 = vmatpush.bf16.msra.mxu0 %v378_v10 }
  0x25   :  { %213 = vmatpush.bf16.msra.mxu1 %v386_v16 }
  0x28   :  { %135 = vmatpush.bf16.msra.mxu0 %v377_v11 }
  0x29   :  { %214 = vmatpush.bf16.msra.mxu1 %v385_v17 }
  0x2c   :  { %136 = vmatpush.bf16.msra.mxu0 %v376_v12 }
  0x2d   :  { %215 = vmatpush.bf16.msra.mxu1 %v384_v18 }
  0x2f   :  { %137 = vmatmul.bf16.vlgmr.msra.gmra.mxu0 %v64_v15 }
  0xac   :  { %v138_v19 = vpop.f32.mrf.mxu0 }
  0xad   :  { %v222_v20 = vmul.f32 %v138_v19, %v138_v19 }
  0xaf   :  { %224 = vadd.xlane.f32.xlu0 %v222_v20 }
  0xb4   :  { %v140_v21 = vpop.f32.mrf.mxu0 }
  0xb5   :  { %v223_v22 = vmul.f32 %v140_v21, %v140_v21  ;;  %v143_v23 = vpack.c.bf16 %v140_v21, %v138_v19 }
  0xb7   :  { %226 = vadd.xlane.f32.xlu0 %v223_v22  ;;  %216 = vmatmul.bf16.vlgmr.msra.gmra.mxu1 %v143_v23 }
 0x122   :  { %v225_v24 = vpop.xlane.xlu0 %224 }
 0x123   :  { %v228_v25 = vmax.f32 %v225_v24, 1e-24 }
 0x125   :  { %400 = vrsqrt.f32 %v228_v25  ;;  %vm236_vm1 = vweird.f32 %v228_v25 }
 0x12a   :  { %v227_v26 = vpop.xlane.xlu0 %226 }
 0x12b   :  { %v401_v27 = vpop.eup %400  ;;  %v229_v28 = vmax.f32 %v227_v26, 1e-24 }
 0x12c   :  { %v231_v29 = vmul.f32 %v401_v27, %v228_v25  ;;  %vm237_vm0 = vweird.f32 %v401_v27 }
 0x12d   :  { %402 = vrsqrt.f32 %v229_v28  ;;  %vm238_vm2 = vmor %vm236_vm1, %vm237_vm0  ;;  %vm246_vm4 = vweird.f32 %v229_v28 }
 0x12e   :  { %v232_v30 = vmul.f32 %v401_v27, %v231_v29 }
 0x130   :  { %v233_v31 = vmul.f32 0.5, %v232_v30 }
 0x132   :  { %v234_v32 = vsub.f32 1.5, %v233_v31 }
 0x133   :  { %v403_v33 = vpop.eup %402 }
 0x134   :  { %v241_v34 = vmul.f32 %v403_v33, %v229_v28  ;;  %v235_v35 = vmul.f32 %v401_v27, %v234_v32  ;;  %v217_v37 = vpop.f32.mrf.mxu1  ;;  %vm247_vm3 = vweird.f32 %v403_v33 }
 0x135   :  { %vm248_vm5 = vmor %vm246_vm4, %vm247_vm3 }
 0x136   :  { %v242_v36 = vmul.f32 %v403_v33, %v241_v34  ;;  %v239_v38 = vsel %vm238_vm2, %v401_v27, %v235_v35 }
 0x137   :  { %v250_v39 = vmul.f32 %v239_v38, %v138_v19  ;;  %v252_v41 = vmul.f32 %v239_v38, %v217_v37 }
 0x138   :  { %v243_v40 = vmul.f32 0.5, %v242_v36 }
 0x139   :  { %v254_v42 = vsub.f32 %v250_v39, %v62_v13 }
 0x13a   :  { %v244_v43 = vsub.f32 1.5, %v243_v40 }
 0x13b   :  { %v256_v44 = vmul.f32 %v254_v42, %v252_v41 }
 0x13c   :  { %v245_v45 = vmul.f32 %v403_v33, %v244_v43  ;;  %v219_v50 = vpop.f32.mrf.mxu1 }
 0x13d   :  { %v258_v46 = vadd.f32 %v256_v44, %v62_v13 }
 0x13e   :  { %v249_v47 = vsel %vm248_vm5, %v403_v33, %v245_v45 }
 0x13f   :  { %v251_v48 = vmul.f32 %v249_v47, %v140_v21  ;;  %v260_v49 = vmul.f32 %v258_v46, %v258_v46  ;;  %v253_v51 = vmul.f32 %v249_v47, %v219_v50 }
 0x141   :  { %v255_v52 = vsub.f32 %v251_v48, %v63_v14  ;;  %262 = vadd.xlane.f32.xlu1 %v260_v49 }
 0x143   :  { %v257_v53 = vmul.f32 %v255_v52, %v253_v51 }
 0x145   :  { %v259_v54 = vadd.f32 %v257_v53, %v63_v14 }
 0x147   :  { %v261_v55 = vmul.f32 %v259_v54, %v259_v54 }
 0x149   :  { %264 = vadd.xlane.f32.xlu1 %v261_v55 }
 0x1b4   :  { %v263_v56 = vpop.xlane.xlu1 %262 }
 0x1b5   :  { %v266_v57 = vmax.f32 %v263_v56, 1e-24 }
 0x1b7   :  { %404 = vrsqrt.f32 %v266_v57  ;;  %vm274_vm7 = vweird.f32 %v266_v57 }
 0x1bc   :  { %v265_v58 = vpop.xlane.xlu1 %264 }
 0x1bd   :  { %v405_v59 = vpop.eup %404  ;;  %v267_v60 = vmax.f32 %v265_v58, 1e-24 }
 0x1be   :  { %v269_v61 = vmul.f32 %v405_v59, %v266_v57  ;;  %vm275_vm6 = vweird.f32 %v405_v59 }
 0x1bf   :  { %406 = vrsqrt.f32 %v267_v60  ;;  %vm276_vm8 = vmor %vm274_vm7, %vm275_vm6  ;;  %vm284_vm10 = vweird.f32 %v267_v60 }
 0x1c0   :  { %v270_v62 = vmul.f32 %v405_v59, %v269_v61 }
 0x1c2   :  { %v271_v63 = vmul.f32 0.5, %v270_v62 }
 0x1c4   :  { %v272_v0 = vsub.f32 1.5, %v271_v63 }
 0x1c5   :  { %v407_v1 = vpop.eup %406 }
 0x1c6   :  { %v273_v2 = vmul.f32 %v405_v59, %v272_v0  ;;  %v279_v3 = vmul.f32 %v407_v1, %v267_v60  ;;  %vm285_vm9 = vweird.f32 %v407_v1 }
 0x1c7   :  { %vm286_vm11 = vmor %vm284_vm10, %vm285_vm9 }
 0x1c8   :  { %v277_v4 = vsel %vm276_vm8, %v405_v59, %v273_v2  ;;  %v280_v5 = vmul.f32 %v407_v1, %v279_v3 }
 0x1c9   :  { %v288_v6 = vmul.f32 %v277_v4, %v258_v46 }
 0x1ca   :  { %v281_v7 = vmul.f32 0.5, %v280_v5 }
 0x1cb   :  { %290 = vst [vmem:[#allocation8] sm:$0xff] %v288_v6 }
 0x1cc   :  { %v282_v8 = vsub.f32 1.5, %v281_v7 }
 0x1ce   :  { %v283_v9 = vmul.f32 %v407_v1, %v282_v8 }
 0x1d0   :  { %v287_v10 = vsel %vm286_vm11, %v407_v1, %v283_v9 }
 0x1d1   :  { %v289_v11 = vmul.f32 %v287_v10, %v259_v54 }
 0x1d3   :  { %291 = vst [vmem:[#allocation8 + $0x8] sm:$0xff] %v289_v11 }
 0x1d4   :  { %304 = dma.vmem_to_hbm [thread:$0]  %s297_s29, 256, %s299_s5, [#allocation4], %s514_s24, %s514_s24, %s515_s25  }
 0x1d5   :  { %508 = dma.done.wait [#allocation4], 256  }
 0x1d6   :  { %509 = vsyncadd [#allocation4], 4294967040 }
 0x1d7   :  { %309 = vsyncpa [#allocation3], 1 }
 0x1d8   :  { %310 = vsyncpa [#allocation6], 1 }
 0x1d9   :  { %311 = vsyncpa [#allocation4], 1 }

</bundles_post_ra>
